<compile_context>
chip_gen: v7x
topology: tpu7x:2x2x1
jax: 0.10.0
libtpu: 0.0.40
codegen_flags: <defaults>
</compile_context>

<pallas_src>
import functools

import numpy as np
import jax
import jax.numpy as jnp
from jax.experimental import pallas as pl
from jax.experimental.pallas import tpu as pltpu


# --------------------------------------------------------------------------
# Kernel
# --------------------------------------------------------------------------
def _dino_loss_kernel(inv_ttemp_ref,        # SMEM (1,) f32: 1 / teacher_temp
                      student_ref,          # (ncrops, TB, D) native dtype
                      teacher_ref,          # (2, TB, D)      native dtype
                      center_ref,           # (1, D) f32
                      ce_ref,               # out (TB, 1) f32  per-row CE partial
                      center_part_ref,      # out (1, 1, D) f32 per-block teacher sum
                      *, ncrops, inv_student_temp):
    inv_ttemp = inv_ttemp_ref[0]
    center = center_ref[...].astype(jnp.float32)                 # (1, D)
    d = center.shape[-1]

    def crop_log_softmax(v):
        s = student_ref[v].astype(jnp.float32) * inv_student_temp
        s = s - jnp.max(s, axis=-1, keepdims=True)
        return s - jnp.log(jnp.sum(jnp.exp(s), axis=-1, keepdims=True))

    # Only lp0, lp1 and the running lp_sum stay live: O(3 * TB * D) f32
    # intermediates regardless of ncrops (was O(ncrops * TB * D)).
    lp0 = crop_log_softmax(0)
    lp1 = crop_log_softmax(1)
    lp_sum = lp0 + lp1
    for v in range(2, ncrops):                                   # static unroll
        lp_sum = lp_sum + crop_log_softmax(v)

    # sum_{v != iq} q_iq . lp_v = (1/Z_iq) * sum_d t_exp_iq * (lp_sum - lp_iq)
    # -> the normalized teacher softmax q is never materialized.
    def teacher_ce(idx, lp_self):
        t = teacher_ref[idx].astype(jnp.float32)                 # (TB, D)
        t_logits = (t - center) * inv_ttemp
        t_exp = jnp.exp(t_logits - jnp.max(t_logits, axis=-1, keepdims=True))
        z = jnp.sum(t_exp, axis=-1, keepdims=True)               # (TB, 1)
        num = jnp.sum(t_exp * (lp_sum - lp_self), axis=-1, keepdims=True)
        # Exact reciprocal keeps the 2e-5 tolerance; approx=True would use the
        # free EUP slot but is lower precision.
        ce = -num * pl.reciprocal(z, approx=False)
        tsum = jnp.sum(t, axis=0, keepdims=True)                 # (1, D) raw sum
        return ce, tsum

    ce0, tsum0 = teacher_ce(0, lp0)
    ce1, tsum1 = teacher_ce(1, lp1)

    ce_ref[...] = ce0 + ce1                                      # (TB, 1)
    center_part_ref[...] = (tsum0 + tsum1).reshape(1, 1, d)      # raw teacher sum


# --------------------------------------------------------------------------
# VMEM budgeting / block choice (generation-aware)
# --------------------------------------------------------------------------
def _tpu_vmem_capacity_bytes():
    """Physical per-core VMEM; conservative fallback if query is unavailable."""
    try:
        cap = int(pltpu.get_tpu_info().vmem_capacity_bytes)
        if cap > 0:
            return cap
    except Exception:
        pass
    return 64 << 20  # v7x per-TC size: safe lower bound for every generation


def _vmem_limit_bytes():
    cap = _tpu_vmem_capacity_bytes()
    if cap <= (64 << 20):
        # v7x: 64 MiB physical -> leave ~20% headroom so the 2-deep
        # double-buffer pipeline and compiler scratch still fit.
        return int(max(32 << 20, min(cap - (12 << 20), 52 << 20)))
    # v5e / v6e: 128 MiB physical -> use ~96 MiB instead of the 32 MiB default.
    return int(min((cap * 3) // 4, 112 << 20))


def _choose_batch_block(batch, ncrops, out_dim, in_itemsize,
                        vmem_limit_bytes, max_rows=512):
    """Largest batch block that divides `batch`, respects the dtype's sublane
    packing, and fits a conservative VMEM working-set budget."""
    rows = ncrops + 2
    # Per batch row: double-buffered native-dtype input tiles + ~4 f32 working
    # copies (lp0, lp1, lp_sum, one temp) of a (TB, D) tile.
    per_b = rows * out_dim * 2 * in_itemsize + 4 * out_dim * 4
    budget = int(vmem_limit_bytes * 0.70)
    cap = max(1, min(max_rows, budget // max(per_b, 1)))
    # dtype-aware sublane multiple: f32 -> 8, bf16 -> 16, int8/fp8 -> 32.
    sub = {4: 8, 2: 16, 1: 32}.get(int(in_itemsize), 8)

    def best_divisor(mult):
        cands = [tb for tb in range(1, batch + 1)
                 if batch % tb == 0 and tb <= cap and tb % mult == 0]
        return max(cands) if cands else None

    tb = best_divisor(sub)
    if tb is None:
        tb = best_divisor(8)
    if tb is None:
        # Never emit a block whose sublane dim is neither a multiple of 8 nor
        # the full batch: the full batch is always BlockSpec-legal.
        tb = batch
    return tb


# --------------------------------------------------------------------------
# Pallas call wrapper
# --------------------------------------------------------------------------
@functools.partial(jax.jit, static_argnames=("batch_block", "student_temp",
                                             "center_momentum",
                                             "vmem_limit_bytes"))
def _dino_loss_fwd(inv_ttemp, student3, teacher3, center, *, batch_block,
                   student_temp, center_momentum, vmem_limit_bytes):
    ncrops, batch, d = student3.shape
    nb = batch // batch_block

    kernel = functools.partial(
        _dino_loss_kernel, ncrops=ncrops,
        inv_student_temp=1.0 / student_temp)

    ce_rows, center_parts = pl.pallas_call(
        kernel,
        grid=(nb,),
        in_specs=[
            pl.BlockSpec(memory_space=pltpu.SMEM),                        # temp
            pl.BlockSpec((ncrops, batch_block, d), lambda i: (0, i, 0)),  # student
            pl.BlockSpec((2, batch_block, d), lambda i: (0, i, 0)),       # teacher
            pl.BlockSpec((1, d), lambda i: (0, 0)),                       # center
        ],
        out_specs=(
            pl.BlockSpec((batch_block, 1), lambda i: (i, 0)),    # per-row CE
            pl.BlockSpec((1, 1, d), lambda i: (i, 0, 0)),        # per-block t-sum
        ),
        out_shape=(
            jax.ShapeDtypeStruct((batch, 1), jnp.float32),
            jax.ShapeDtypeStruct((nb, 1, d), jnp.float32),
        ),
        compiler_params=pltpu.CompilerParams(
            dimension_semantics=("parallel",),        # no carried state -> both TCs on v7x
            vmem_limit_bytes=vmem_limit_bytes),
    )(inv_ttemp, student3, teacher3, center)

    # Tiny final reduction + EMA in plain JAX (negligible vs. the streamed reads).
    n_terms = 2 * (ncrops - 1)
    loss = jnp.sum(ce_rows) * (1.0 / (batch * n_terms))
    # TODO(synk): dist.all_reduce of batch_center across hosts (world_size > 1).
    batch_center = jnp.sum(center_parts, axis=(0, 1)).reshape(1, d) * (1.0 / (2.0 * batch))
    new_center = center * center_momentum + batch_center * (1.0 - center_momentum)
    return loss, new_center


class DINOLoss:
    """JAX/Pallas port of the PyTorch DINOLoss module (forward + center update)."""

    def __init__(self, out_dim, ncrops, warmup_teacher_temp, teacher_temp,
                 warmup_teacher_temp_epochs, nepochs,
                 student_temp=0.1, center_momentum=0.9):
        self.student_temp = float(student_temp)
        self.center_momentum = float(center_momentum)
        self.ncrops = int(ncrops)
        self.out_dim = int(out_dim)
        # register_buffer('center', zeros(1, out_dim))
        self.center = jnp.zeros((1, out_dim), jnp.float32)
        self.teacher_temp_schedule = np.concatenate((
            np.linspace(warmup_teacher_temp, teacher_temp,
                        warmup_teacher_temp_epochs),
            np.ones(nepochs - warmup_teacher_temp_epochs) * teacher_temp))

    def __call__(self, student_output, teacher_output, epoch, batch_block=None):
        n_total, d = student_output.shape
        assert d == self.out_dim
        assert n_total % self.ncrops == 0
        batch = n_total // self.ncrops
        assert teacher_output.shape == (2 * batch, d)
        assert self.ncrops >= 2

        # Teacher temperature is runtime data (SMEM) -> one compile for the
        # whole warmup schedule.
        temp = float(self.teacher_temp_schedule[epoch])
        inv_ttemp = jnp.asarray([1.0 / temp], dtype=jnp.float32)

        # Keep the native input dtype (e.g. bf16); the kernel upcasts to f32.
        student3 = student_output.reshape(self.ncrops, batch, d)
        teacher3 = teacher_output.reshape(2, batch, d)

        itemsize = jnp.dtype(student_output.dtype).itemsize
        vmem_limit = _vmem_limit_bytes()
        if batch_block is None:
            batch_block = _choose_batch_block(batch, self.ncrops, d, itemsize,
                                              vmem_limit)
        batch_block = int(batch_block)
        assert batch % batch_block == 0
        assert batch_block % 8 == 0 or batch_block == batch, (
            "batch_block must be a multiple of 8 or the full batch")

        loss, new_center = _dino_loss_fwd(
            inv_ttemp, student3, teacher3, self.center,
            batch_block=batch_block,
            student_temp=self.student_temp,
            center_momentum=self.center_momentum,
            vmem_limit_bytes=int(vmem_limit))

        # Stateful buffer update (like the PyTorch module's self.center).
        self.center = new_center
        return loss


# --------------------------------------------------------------------------
# Pure-JAX reference (mirrors the PyTorch forward) and self-test
# --------------------------------------------------------------------------
def _reference(student_output, teacher_output, center, ncrops, student_temp,
               teacher_temp, center_momentum):
    s = student_output / student_temp
    batch = student_output.shape[0] // ncrops
    student_chunks = [s[i * batch:(i + 1) * batch] for i in range(ncrops)]
    t = jax.nn.softmax((teacher_output - center) / teacher_temp, axis=-1)
    teacher_chunks = [t[i * batch:(i + 1) * batch] for i in range(2)]
    total, n_terms = 0.0, 0
    for iq, q in enumerate(teacher_chunks):
        for v in range(ncrops):
            if v == iq:
                continue
            loss = jnp.sum(-q * jax.nn.log_softmax(student_chunks[v], axis=-1),
                           axis=-1)
            total = total + jnp.mean(loss)
            n_terms += 1
    total = total / n_terms
    batch_center = (jnp.sum(teacher_output, axis=0, keepdims=True)
                    / teacher_output.shape[0])
    new_center = center * center_momentum + batch_center * (1.0 - center_momentum)
    return total, new_center


if __name__ == "__main__":
    out_dim = 256
    ncrops = 4
    batch = 16
    epoch = 3

    key = jax.random.PRNGKey(0)
    k1, k2 = jax.random.split(key)
    student_output = jax.random.normal(k1, (ncrops * batch, out_dim), jnp.float32)
    teacher_output = jax.random.normal(k2, (2 * batch, out_dim), jnp.float32)

    # --- f32 inputs, forced multi-block grid (2 batch blocks of 8 rows) ------
    dino = DINOLoss(out_dim=out_dim, ncrops=ncrops,
                    warmup_teacher_temp=0.04, teacher_temp=0.07,
                    warmup_teacher_temp_epochs=10, nepochs=100,
                    student_temp=0.1, center_momentum=0.9)
    temp = float(dino.teacher_temp_schedule[epoch])
    ref_loss, ref_center = _reference(student_output, teacher_output, dino.center,
                                      ncrops, dino.student_temp, temp,
                                      dino.center_momentum)
    loss = dino(student_output, teacher_output, epoch, batch_block=8)
    jax.block_until_ready(loss)
    jax.block_until_ready(dino.center)
    assert jnp.allclose(loss, ref_loss, rtol=2e-5, atol=2e-5), (loss, ref_loss)
    assert jnp.allclose(dino.center, ref_center, rtol=1e-5, atol=1e-6)

    # --- bf16 inputs (native dtype into the kernel), auto block size ---------
    student_bf16 = student_output.astype(jnp.bfloat16)
    teacher_bf16 = teacher_output.astype(jnp.bfloat16)
    dino2 = DINOLoss(out_dim=out_dim, ncrops=ncrops,
                     warmup_teacher_temp=0.04, teacher_temp=0.07,
                     warmup_teacher_temp_epochs=10, nepochs=100,
                     student_temp=0.1, center_momentum=0.9)
    ref_loss2, ref_center2 = _reference(student_bf16.astype(jnp.float32),
                                        teacher_bf16.astype(jnp.float32),
                                        dino2.center, ncrops, dino2.student_temp,
                                        temp, dino2.center_momentum)
    loss2 = dino2(student_bf16, teacher_bf16, epoch)
    jax.block_until_ready(loss2)
    jax.block_until_ready(dino2.center)
    assert jnp.allclose(loss2, ref_loss2, rtol=5e-5, atol=5e-5), (loss2, ref_loss2)
    assert jnp.allclose(dino2.center, ref_center2, rtol=1e-4, atol=1e-5)

    print("KERNEL_OK")
</pallas_src>

<mosaic_0001>
module attributes {stable_mosaic.version = 11 : i64} {
  func.func @_dino_loss_kernel(%arg0: i32, %arg1: memref<1xf32, #tpu.memory_space<smem>>, %arg2: memref<4x8x256xf32, #tpu.memory_space<vmem>>, %arg3: memref<2x8x256xf32, #tpu.memory_space<vmem>>, %arg4: memref<1x256xf32, #tpu.memory_space<vmem>>, %arg5: memref<8x1xf32, #tpu.memory_space<vmem>>, %arg6: memref<1x1x256xf32, #tpu.memory_space<vmem>>) attributes {dimension_semantics = [#tpu.dimension_semantics<parallel>], iteration_bounds = array<i64: 2>, scalar_prefetch = 0 : i64, scratch_operands = 0 : i64, tpu.core_type = #tpu.core_type<tc>, window_params = [{transform_indices = @transform_0, window_bounds = array<i64: 1>}, {transform_indices = @transform_1, window_bounds = array<i64: 4, 8, 256>}, {transform_indices = @transform_2, window_bounds = array<i64: 2, 8, 256>}, {pipeline_mode = #tpu.pipeline_mode<synchronous>, transform_indices = @transform_3, window_bounds = array<i64: 1, 256>}, {transform_indices = @transform_4, window_bounds = array<i64: 8, 1>}, {transform_indices = @transform_5, window_bounds = array<i64: 1, 1, 256>}]} {
    %c0 = arith.constant 0 : index
    %0 = memref.load %arg1[%c0] : memref<1xf32, #tpu.memory_space<smem>>
    %c0_0 = arith.constant 0 : index
    %c0_1 = arith.constant 0 : index
    %1 = vector.load %arg4[%c0_0, %c0_1] : memref<1x256xf32, #tpu.memory_space<vmem>>, vector<1x256xf32>
    %c0_2 = arith.constant 0 : index
    %c0_3 = arith.constant 0 : index
    %c0_4 = arith.constant 0 : index
    %2 = vector.load %arg2[%c0_2, %c0_3, %c0_4] : memref<4x8x256xf32, #tpu.memory_space<vmem>>, vector<1x8x256xf32>
    %3 = vector.shape_cast %2 : vector<1x8x256xf32> to vector<8x256xf32>
    %cst = arith.constant 1.000000e+01 : f32
    %4 = vector.broadcast %cst : f32 to vector<8x256xf32>
    %5 = arith.mulf %3, %4 : vector<8x256xf32>
    %cst_5 = arith.constant dense<0xFF800000> : vector<8xf32>
    %6 = vector.multi_reduction <maximumf>, %5, %cst_5 [1] : vector<8x256xf32> to vector<8xf32>
    %7 = vector.shape_cast %6 : vector<8xf32> to vector<8x1xf32>
    %8 = vector.broadcast %7 : vector<8x1xf32> to vector<8x256xf32>
    %9 = arith.subf %5, %8 : vector<8x256xf32>
    %10 = math.exp %9 : vector<8x256xf32>
    %cst_6 = arith.constant dense<0.000000e+00> : vector<8xf32>
    %11 = vector.multi_reduction <add>, %10, %cst_6 [1] : vector<8x256xf32> to vector<8xf32>
    %12 = vector.shape_cast %11 : vector<8xf32> to vector<8x1xf32>
    %13 = math.log %12 : vector<8x1xf32>
    %14 = vector.broadcast %13 : vector<8x1xf32> to vector<8x256xf32>
    %15 = arith.subf %9, %14 : vector<8x256xf32>
    %c1 = arith.constant 1 : index
    %c0_7 = arith.constant 0 : index
    %c0_8 = arith.constant 0 : index
    %16 = vector.load %arg2[%c1, %c0_7, %c0_8] : memref<4x8x256xf32, #tpu.memory_space<vmem>>, vector<1x8x256xf32>
    %17 = vector.shape_cast %16 : vector<1x8x256xf32> to vector<8x256xf32>
    %cst_9 = arith.constant 1.000000e+01 : f32
    %18 = vector.broadcast %cst_9 : f32 to vector<8x256xf32>
    %19 = arith.mulf %17, %18 : vector<8x256xf32>
    %cst_10 = arith.constant dense<0xFF800000> : vector<8xf32>
    %20 = vector.multi_reduction <maximumf>, %19, %cst_10 [1] : vector<8x256xf32> to vector<8xf32>
    %21 = vector.shape_cast %20 : vector<8xf32> to vector<8x1xf32>
    %22 = vector.broadcast %21 : vector<8x1xf32> to vector<8x256xf32>
    %23 = arith.subf %19, %22 : vector<8x256xf32>
    %24 = math.exp %23 : vector<8x256xf32>
    %cst_11 = arith.constant dense<0.000000e+00> : vector<8xf32>
    %25 = vector.multi_reduction <add>, %24, %cst_11 [1] : vector<8x256xf32> to vector<8xf32>
    %26 = vector.shape_cast %25 : vector<8xf32> to vector<8x1xf32>
    %27 = math.log %26 : vector<8x1xf32>
    %28 = vector.broadcast %27 : vector<8x1xf32> to vector<8x256xf32>
    %29 = arith.subf %23, %28 : vector<8x256xf32>
    %30 = arith.addf %15, %29 : vector<8x256xf32>
    %c2 = arith.constant 2 : index
    %c0_12 = arith.constant 0 : index
    %c0_13 = arith.constant 0 : index
    %31 = vector.load %arg2[%c2, %c0_12, %c0_13] : memref<4x8x256xf32, #tpu.memory_space<vmem>>, vector<1x8x256xf32>
    %32 = vector.shape_cast %31 : vector<1x8x256xf32> to vector<8x256xf32>
    %cst_14 = arith.constant 1.000000e+01 : f32
    %33 = vector.broadcast %cst_14 : f32 to vector<8x256xf32>
    %34 = arith.mulf %32, %33 : vector<8x256xf32>
    %cst_15 = arith.constant dense<0xFF800000> : vector<8xf32>
    %35 = vector.multi_reduction <maximumf>, %34, %cst_15 [1] : vector<8x256xf32> to vector<8xf32>
    %36 = vector.shape_cast %35 : vector<8xf32> to vector<8x1xf32>
    %37 = vector.broadcast %36 : vector<8x1xf32> to vector<8x256xf32>
    %38 = arith.subf %34, %37 : vector<8x256xf32>
    %39 = math.exp %38 : vector<8x256xf32>
    %cst_16 = arith.constant dense<0.000000e+00> : vector<8xf32>
    %40 = vector.multi_reduction <add>, %39, %cst_16 [1] : vector<8x256xf32> to vector<8xf32>
    %41 = vector.shape_cast %40 : vector<8xf32> to vector<8x1xf32>
    %42 = math.log %41 : vector<8x1xf32>
    %43 = vector.broadcast %42 : vector<8x1xf32> to vector<8x256xf32>
    %44 = arith.subf %38, %43 : vector<8x256xf32>
    %45 = arith.addf %30, %44 : vector<8x256xf32>
    %c3 = arith.constant 3 : index
    %c0_17 = arith.constant 0 : index
    %c0_18 = arith.constant 0 : index
    %46 = vector.load %arg2[%c3, %c0_17, %c0_18] : memref<4x8x256xf32, #tpu.memory_space<vmem>>, vector<1x8x256xf32>
    %47 = vector.shape_cast %46 : vector<1x8x256xf32> to vector<8x256xf32>
    %cst_19 = arith.constant 1.000000e+01 : f32
    %48 = vector.broadcast %cst_19 : f32 to vector<8x256xf32>
    %49 = arith.mulf %47, %48 : vector<8x256xf32>
    %cst_20 = arith.constant dense<0xFF800000> : vector<8xf32>
    %50 = vector.multi_reduction <maximumf>, %49, %cst_20 [1] : vector<8x256xf32> to vector<8xf32>
    %51 = vector.shape_cast %50 : vector<8xf32> to vector<8x1xf32>
    %52 = vector.broadcast %51 : vector<8x1xf32> to vector<8x256xf32>
    %53 = arith.subf %49, %52 : vector<8x256xf32>
    %54 = math.exp %53 : vector<8x256xf32>
    %cst_21 = arith.constant dense<0.000000e+00> : vector<8xf32>
    %55 = vector.multi_reduction <add>, %54, %cst_21 [1] : vector<8x256xf32> to vector<8xf32>
    %56 = vector.shape_cast %55 : vector<8xf32> to vector<8x1xf32>
    %57 = math.log %56 : vector<8x1xf32>
    %58 = vector.broadcast %57 : vector<8x1xf32> to vector<8x256xf32>
    %59 = arith.subf %53, %58 : vector<8x256xf32>
    %60 = arith.addf %45, %59 : vector<8x256xf32>
    %c0_22 = arith.constant 0 : index
    %c0_23 = arith.constant 0 : index
    %c0_24 = arith.constant 0 : index
    %61 = vector.load %arg3[%c0_22, %c0_23, %c0_24] : memref<2x8x256xf32, #tpu.memory_space<vmem>>, vector<1x8x256xf32>
    %62 = vector.shape_cast %61 : vector<1x8x256xf32> to vector<8x256xf32>
    %63 = vector.broadcast %1 : vector<1x256xf32> to vector<8x256xf32>
    %64 = arith.subf %62, %63 : vector<8x256xf32>
    %65 = vector.broadcast %0 : f32 to vector<8x256xf32>
    %66 = arith.mulf %64, %65 : vector<8x256xf32>
    %cst_25 = arith.constant dense<0xFF800000> : vector<8xf32>
    %67 = vector.multi_reduction <maximumf>, %66, %cst_25 [1] : vector<8x256xf32> to vector<8xf32>
    %68 = vector.shape_cast %67 : vector<8xf32> to vector<8x1xf32>
    %69 = vector.broadcast %68 : vector<8x1xf32> to vector<8x256xf32>
    %70 = arith.subf %66, %69 : vector<8x256xf32>
    %71 = math.exp %70 : vector<8x256xf32>
    %cst_26 = arith.constant dense<0.000000e+00> : vector<8xf32>
    %72 = vector.multi_reduction <add>, %71, %cst_26 [1] : vector<8x256xf32> to vector<8xf32>
    %73 = vector.shape_cast %72 : vector<8xf32> to vector<8x1xf32>
    %74 = arith.subf %60, %15 : vector<8x256xf32>
    %75 = arith.mulf %71, %74 : vector<8x256xf32>
    %cst_27 = arith.constant dense<0.000000e+00> : vector<8xf32>
    %76 = vector.multi_reduction <add>, %75, %cst_27 [1] : vector<8x256xf32> to vector<8xf32>
    %77 = vector.shape_cast %76 : vector<8xf32> to vector<8x1xf32>
    %cst_28 = arith.constant 0.000000e+00 : f32
    %78 = vector.broadcast %cst_28 : f32 to vector<8x1xf32>
    %79 = arith.subf %78, %77 : vector<8x1xf32>
    %80 = tpu.reciprocal %73 : vector<8x1xf32> -> vector<8x1xf32>
    %81 = arith.mulf %79, %80 : vector<8x1xf32>
    %cst_29 = arith.constant dense<0.000000e+00> : vector<256xf32>
    %82 = vector.multi_reduction <add>, %62, %cst_29 [0] : vector<8x256xf32> to vector<256xf32>
    %83 = vector.shape_cast %82 : vector<256xf32> to vector<1x256xf32>
    %c1_30 = arith.constant 1 : index
    %c0_31 = arith.constant 0 : index
    %c0_32 = arith.constant 0 : index
    %84 = vector.load %arg3[%c1_30, %c0_31, %c0_32] : memref<2x8x256xf32, #tpu.memory_space<vmem>>, vector<1x8x256xf32>
    %85 = vector.shape_cast %84 : vector<1x8x256xf32> to vector<8x256xf32>
    %86 = vector.broadcast %1 : vector<1x256xf32> to vector<8x256xf32>
    %87 = arith.subf %85, %86 : vector<8x256xf32>
    %88 = vector.broadcast %0 : f32 to vector<8x256xf32>
    %89 = arith.mulf %87, %88 : vector<8x256xf32>
    %cst_33 = arith.constant dense<0xFF800000> : vector<8xf32>
    %90 = vector.multi_reduction <maximumf>, %89, %cst_33 [1] : vector<8x256xf32> to vector<8xf32>
    %91 = vector.shape_cast %90 : vector<8xf32> to vector<8x1xf32>
    %92 = vector.broadcast %91 : vector<8x1xf32> to vector<8x256xf32>
    %93 = arith.subf %89, %92 : vector<8x256xf32>
    %94 = math.exp %93 : vector<8x256xf32>
    %cst_34 = arith.constant dense<0.000000e+00> : vector<8xf32>
    %95 = vector.multi_reduction <add>, %94, %cst_34 [1] : vector<8x256xf32> to vector<8xf32>
    %96 = vector.shape_cast %95 : vector<8xf32> to vector<8x1xf32>
    %97 = arith.subf %60, %29 : vector<8x256xf32>
    %98 = arith.mulf %94, %97 : vector<8x256xf32>
    %cst_35 = arith.constant dense<0.000000e+00> : vector<8xf32>
    %99 = vector.multi_reduction <add>, %98, %cst_35 [1] : vector<8x256xf32> to vector<8xf32>
    %100 = vector.shape_cast %99 : vector<8xf32> to vector<8x1xf32>
    %cst_36 = arith.constant 0.000000e+00 : f32
    %101 = vector.broadcast %cst_36 : f32 to vector<8x1xf32>
    %102 = arith.subf %101, %100 : vector<8x1xf32>
    %103 = tpu.reciprocal %96 : vector<8x1xf32> -> vector<8x1xf32>
    %104 = arith.mulf %102, %103 : vector<8x1xf32>
    %cst_37 = arith.constant dense<0.000000e+00> : vector<256xf32>
    %105 = vector.multi_reduction <add>, %85, %cst_37 [0] : vector<8x256xf32> to vector<256xf32>
    %106 = vector.shape_cast %105 : vector<256xf32> to vector<1x256xf32>
    %107 = arith.addf %81, %104 : vector<8x1xf32>
    %c0_38 = arith.constant 0 : index
    %c0_39 = arith.constant 0 : index
    %108 = vector.load %arg5[%c0_38, %c0_39] : memref<8x1xf32, #tpu.memory_space<vmem>>, vector<8x1xf32>
    tpu.vector_store %arg5[%c0_38, %c0_39], %107 {strides = array<i32>} : memref<8x1xf32, #tpu.memory_space<vmem>>, vector<8x1xf32>,
    %109 = arith.addf %83, %106 : vector<1x256xf32>
    %110 = vector.shape_cast %109 : vector<1x256xf32> to vector<1x1x256xf32>
    %c0_40 = arith.constant 0 : index
    %c0_41 = arith.constant 0 : index
    %c0_42 = arith.constant 0 : index
    %111 = vector.load %arg6[%c0_40, %c0_41, %c0_42] : memref<1x1x256xf32, #tpu.memory_space<vmem>>, vector<1x1x256xf32>
    tpu.vector_store %arg6[%c0_40, %c0_41, %c0_42], %110 {strides = array<i32>} : memref<1x1x256xf32, #tpu.memory_space<vmem>>, vector<1x1x256xf32>,
    return
  }
  func.func @transform_0(%arg0: i32) -> i32 {
    %c0_i32 = arith.constant 0 : i32
    %c0_i32_0 = arith.constant 0 : i32
    return %c0_i32 : i32
  }
  func.func @transform_1(%arg0: i32) -> (i32, i32, i32) {
    %c0_i32 = arith.constant 0 : i32
    %c0_i32_0 = arith.constant 0 : i32
    %c0_i32_1 = arith.constant 0 : i32
    return %c0_i32, %arg0, %c0_i32_0 : i32, i32, i32
  }
  func.func @transform_2(%arg0: i32) -> (i32, i32, i32) {
    %c0_i32 = arith.constant 0 : i32
    %c0_i32_0 = arith.constant 0 : i32
    %c0_i32_1 = arith.constant 0 : i32
    return %c0_i32, %arg0, %c0_i32_0 : i32, i32, i32
  }
  func.func @transform_3(%arg0: i32) -> (i32, i32) {
    %c0_i32 = arith.constant 0 : i32
    %c0_i32_0 = arith.constant 0 : i32
    %c0_i32_1 = arith.constant 0 : i32
    return %c0_i32, %c0_i32_0 : i32, i32
  }
  func.func @transform_4(%arg0: i32) -> (i32, i32) {
    %c0_i32 = arith.constant 0 : i32
    %c0_i32_0 = arith.constant 0 : i32
    return %arg0, %c0_i32 : i32, i32
  }
  func.func @transform_5(%arg0: i32) -> (i32, i32, i32) {
    %c0_i32 = arith.constant 0 : i32
    %c0_i32_0 = arith.constant 0 : i32
    %c0_i32_1 = arith.constant 0 : i32
    return %arg0, %c0_i32, %c0_i32_0 : i32, i32, i32
  }
}

</mosaic_0001>

<bundles_post_ra>
// kernel: _dino_loss_fwd.1
= control target key start
LH: loop header
LB: loop body
LE: loop exit
PB: predicated region body
PF: predicated region fallthrough
CT: control target
= control target key end

     0   :  { %s1142_s0 = inlined_call_operand.<no memory space> [shape: f32[1], index: 0, kind: input, shape index: {}]   ;;  %s1143_s1 = inlined_call_operand.hbm [shape: f32[4,16,256], index: 1, kind: input, shape index: {}]   ;;  %s1144_s2 = inlined_call_operand.hbm [shape: f32[2,16,256], index: 2, kind: input, shape index: {}]   ;;  %s1145_s3 = inlined_call_operand.vmem [shape: f32[1,256], index: 3, kind: input, shape index: {}]   ;;  %s1146_s4 = inlined_call_operand.vmem [shape: f32[16,1], index: 4, kind: output, shape index: {0}]   ;;  %s1147_s5 = inlined_call_operand.vmem [shape: f32[2,1,256], index: 5, kind: output, shape index: {1}]  }
   0x1   :  { %11 = sst [smem:[#allocation2]] %s1142_s0 }
   0x2   :  { %12 = vsyncpa [#allocation4], 0 }
   0x3   :  { %14 = vsyncpa [#allocation4 + $0x1], 0 }
   0x4   :  { %15 = vsyncpa [#allocation6], 0 }
   0x5   :  { %17 = vsyncpa [#allocation6 + $0x1], 0  ;;  %s875_s20 = smov 0   ;;  %s877_s21 = smov 0  }
   0x6   :  { %s879_s22 = smov 0   ;;  %s881_s23 = smov 0  }
   0x7 LB: > { %s894_s0 = sadd.s32 4294967295, %s834_s23   ;;  %s897_s24 = sadd.s32 1, %s834_s23   ;;  %s834_s23 = sphi %s881_s23, %s1156_s23   ;;  %s830_s22 = sphi %s879_s22, %s1155_s22   ;;  %s826_s21 = sphi %s877_s21, %s1154_s21   ;;  %s822_s20 = sphi %s875_s20, %s1153_s20  }
   0x8   : > { %s48_s25 = ssub.s32 %s834_s23, %s897_s24  ;;  %s51_s26 = sadd.s32 1, %s830_s22 }
   0x9   : > { %p49_p0 = scmp.eq.s32.totalorder %s48_s25, 0  ;;  %p58_p1 = scmp.ne.s32.totalorder %s830_s22, %s826_s21 }
   0xa   : > { %p59_p2 = scmp.eq.s32.totalorder %s834_s23, 0  ;;  %p64_p3 = scmp.ne.s32.totalorder %s826_s21, %s822_s20 }
   0xb   : > { %s907_s27 = scalar_select %p49_p0, %s830_s22, %s51_s26  }
   0xc   : > { %p60_p4 = por %p59_p2, %p58_p1  ;;  %p65_p5 = scmp.eq.s32.totalorder %s894_s0, 0 }
   0xd   : > { %p663_p6 = scmp.lt.s32.totalorder %s834_s23, 2  ;;  %s916_s29 = sand.u32 1, %s830_s22  }
   0xe   : > { %p911_p7 = por %p65_p5, %p64_p3  ;;  %s629_s30 = sshll.u32 %s916_s29, 6 }
   0xf   : > { %s650_s6 = sshll.u32 %s834_s23, 8  ;;  %s197_s10 = scalar_lea.vmem [#allocation3], %s629_s30 }
  0x10   : > { %s1149_s28 = scalar_select %p911_p7, 1, 0 }
  0x11   : > { %s925_s9 = scalar_lea.hbm %s1143_s1, %s650_s6  ;;  %s204_s11 = sshll.u32 %s197_s10, 4  ;;  %s927_s11 = int_to_ptr.vmem [resolvable:$true] %s204_s11 }
  0x12   : > { %p929_p8 = pnand %p663_p6, %p60_p4  ;;  %s194_s13 = scalar_lea.sflag [#allocation4], %s916_s29 }
  0x13   : > { %s736_s14 = scalar_lea.hbm %s925_s9, 1024  ;;  %s741_s17 = scalar_lea.hbm %s1143_s1, 2048 }
  0x14   : > { %p737_p9 = scmp.ne.s32.totalorder %s925_s9, %s736_s14  ;;  %p738_p10 = pneg %p929_p8 }
  0x15   : > { %p742_p13 = scmp.lt.u32.totalorder %s925_s9, %s1143_s1  ;;  %p743_p0 = scmp.lt.u32.totalorder %s741_s17, %s736_s14 }
  0x16   : > { %p739_p11 = pnand %p738_p10, %p737_p9  ;;  %p745_p2 = scmp.lt.u32.totalorder %s736_s14, %s925_s9 }
  0x17   : > { %p744_p1 = por %p743_p0, %p742_p13 }
  0x18   : > { %p740_p12 = pneg %p739_p11 }
  0x19   : > { %p746_p3 = por %p745_p2, %p744_p1 }
  0x1b   : > { %p747_p4 = pnand %p746_p3, %p740_p12 }
  0x1d   : > { %750 = shalt.err (!%p747_p4)
}
  0x1e   : > { %s751_s20 = scalar_lea.vmem %s927_s11, 1024  ;;  %s836_s25 = smov [#allocation3]  }
  0x1f   : > { %p752_p5 = scmp.ne.s32.totalorder %s927_s11, %s751_s20  ;;  %s756_s26 = sshll.u32 %s836_s25, 4  ;;  %s757_s26 = int_to_ptr.vmem [resolvable:$false] %s756_s26 }
  0x20   : > { %s758_s30 = scalar_lea.vmem %s757_s26, 2048  ;;  %p759_p11 = scmp.lt.s32.totalorder %s927_s11, %s757_s26 }
  0x21   : > { %p754_p6 = pnand %p752_p5, %p738_p10  ;;  %p760_p13 = scmp.lt.s32.totalorder %s758_s30, %s751_s20 }
  0x23   : > { %p755_p9 = pneg %p754_p6  ;;  %p761_p0 = por %p760_p13, %p759_p11 }
  0x25   : > { %p762_p1 = pnand %p761_p0, %p755_p9 }
  0x27   : > { %765 = shalt.err (!%p762_p1)
}
  0x28   : > { %s837_s7 = smov 512   ;;  %s838_s8 = smov 256  }
  0x29   : > { %s839_s10 = smov 16   ;;  %p635_p12 = scmp.ge.s32.totalorder %s834_s23, 1 }
  0x2a   : > { %659 = dma.hbm_to_vmem [thread:$0]  (!%p929_p8), %s925_s9, 1024, %s927_s11, %s194_s13, %s837_s7, %s838_s8, %s839_s10  }
  0x2b   : > { %p233_p2 = scmp.lt.s32.totalorder %s834_s23, 3  ;;  %s632_s14 = sshll.u32 %s916_s29, 5 }
  0x2c   : > { %s976_s18 = scalar_lea.hbm %s1144_s2, %s650_s6  ;;  %s218_s19 = scalar_lea.vmem [#allocation5], %s632_s14 }
  0x2d   : > { %p967_p3 = pnand %p635_p12, %p233_p2  ;;  %s225_s20 = sshll.u32 %s218_s19, 4  ;;  %s978_s20 = int_to_ptr.vmem [resolvable:$true] %s225_s20 }
  0x2e   : > { %s215_s9 = scalar_lea.sflag [#allocation6], %s916_s29  ;;  %s766_s11 = scalar_lea.hbm %s976_s18, 512 }
  0x2f   : > { %p767_p4 = scmp.ne.s32.totalorder %s976_s18, %s766_s11  ;;  %s771_s6 = scalar_lea.hbm %s1144_s2, 1024 }
  0x30   : > { %p772_p9 = scmp.lt.u32.totalorder %s976_s18, %s1144_s2  ;;  %p773_p11 = scmp.lt.u32.totalorder %s771_s6, %s766_s11 }
  0x31   : > { %p769_p5 = pnand %p767_p4, %p738_p10  ;;  %p775_p0 = scmp.lt.u32.totalorder %s766_s11, %s976_s18 }
  0x32   : > { %p774_p13 = por %p773_p11, %p772_p9 }
  0x33   : > { %p770_p6 = pneg %p769_p5 }
  0x34   : > { %p776_p1 = por %p775_p0, %p774_p13 }
  0x36   : > { %p777_p12 = pnand %p776_p1, %p770_p6 }
  0x38   : > { %780 = shalt.err (!%p777_p12)
}
  0x39   : > { %s781_s30 = scalar_lea.vmem %s978_s20, 512  ;;  %s840_s14 = smov [#allocation5]  }
  0x3a   : > { %p782_p2 = scmp.ne.s32.totalorder %s978_s20, %s781_s30  ;;  %s786_s16 = sshll.u32 %s840_s14, 4  ;;  %s787_s16 = int_to_ptr.vmem [resolvable:$false] %s786_s16 }
  0x3b   : > { %s788_s17 = scalar_lea.vmem %s787_s16, 1024  ;;  %p789_p7 = scmp.lt.s32.totalorder %s978_s20, %s787_s16 }
  0x3c   : > { %p784_p4 = pnand %p782_p2, %p738_p10  ;;  %p790_p9 = scmp.lt.s32.totalorder %s788_s17, %s781_s30 }
  0x3e   : > { %p785_p5 = pneg %p784_p4  ;;  %p791_p11 = por %p790_p9, %p789_p7 }
  0x40   : > { %p792_p13 = pnand %p791_p11, %p785_p5 }
  0x42   : > { %795 = shalt.err (!%p792_p13)
}
  0x43   : > { %662 = dma.hbm_to_vmem [thread:$0]  (!%p929_p8), %s976_s18, 512, %s978_s20, %s215_s9, %s837_s7, %s838_s8, %s839_s10  }
  0x44   : > { %237 = sbr.rel (%p967_p3) target bundleno = 566 (0x236), region = 36  ;;  %s239_s19 = sand.u32 (!%p967_p3), 1, %s826_s21  }
  0x45   : > { %s636_s11 = sshll.u32 (!%p967_p3), %s239_s19, 6  ;;  %s240_s23 = scalar_lea.sflag (!%p967_p3), [#allocation4], %s239_s19 }
  0x46   : > { %s243_s13 = scalar_lea.vmem (!%p967_p3), [#allocation3], %s636_s11  ;;  %p1152_p7 = scmp.ne.s32.totalorder (!%p967_p3), %s1149_s28, 0 }
  0x4b   : > { %813 = dma.done.wait (%p1152_p7), %s240_s23, 1024  }
  0x4c   : > { %815 = vsyncadd (%p1152_p7), %s240_s23, 4294966272  ;;  %s637_s12 = sshll.u32 %s239_s19, 5  ;;  %s249_s29 = scalar_lea.sflag [#allocation6], %s239_s19 }
  0x4d   : > { %s1016_s6 = scalar_lea.vmem [#allocation5], %s637_s12 }
  0x4e   : > { %817 = dma.done.wait (%p1152_p7), %s249_s29, 512  }
  0x4f   : > { %819 = vsyncadd (%p1152_p7), %s249_s29, 4294966784  ;;  %v297_v0 = vld [vmem:[%s243_s13] sm:$0xff]  ;;  %v298_v1 = vld [vmem:[%s243_s13 + $0x8] sm:$0xff]  ;;  %v389_v20 = vlaneseq  ;;  %s295_s28 = sld [smem:[#allocation2]]  ;;  %v841_v51 = vmov 1966171168  }
  0x50   : > { %v642_v2 = vld [vmem:[%s243_s13 + $0x20] sm:$0xff]  ;;  %v1022_v3 = vmul.f32 10.0, %v297_v0  ;;  %v1024_v4 = vmul.f32 10.0, %v298_v1  ;;  %v643_v5 = vld [vmem:[%s243_s13 + $0x28] sm:$0xff]  ;;  %v640_v7 = vld [vmem:[%s243_s13 + $0x10] sm:$0xff]  ;;  %v488_v52 = vunpack.c.l.s4 %v841_v51  ;;  %p287_p8 = scmp.lt.s32.totalorder %s894_s0, 1 }
  0x51   : > { %v1026_v6 = vmul.f32 10.0, %v642_v2  ;;  %v641_v8 = vld [vmem:[%s243_s13 + $0x18] sm:$0xff]  ;;  %v1028_v9 = vmul.f32 10.0, %v643_v5  ;;  %v1030_v10 = vmul.f32 10.0, %v640_v7  ;;  %v644_v12 = vld [vmem:[%s243_s13 + $0x30] sm:$0xff]  ;;  %v390_v21 = vshrl.u32 %v389_v20, 7 }
  0x52   : > { %v1032_v11 = vmul.f32 10.0, %v641_v8  ;;  %v645_v13 = vld [vmem:[%s243_s13 + $0x38] sm:$0xff]  ;;  %v301_v14 = vmax.f32 %v1022_v3, %v1024_v4  ;;  %v1036_v15 = vmul.f32 10.0, %v644_v12  ;;  %v296_v24 = vld [vmem:[%s1145_s3] sm:$0x3]  ;;  %v387_v28 = vld [vmem:[%s1016_s6 + $0x8] sm:$0xff]  ;;  %v489_v1 = vunpack.c.0.s8 %v488_v52 }
  0x53   : > { %v1038_v16 = vmul.f32 10.0, %v645_v13  ;;  %v345_v17 = vmax.f32 %v1026_v6, %v1028_v9  ;;  %v391_v22 = vsub.s32 0, %v390_v21  ;;  %v395_v23 = vsub.s32 1, %v390_v21  ;;  %v386_v27 = vld [vmem:[%s1016_s6] sm:$0xff]  ;;  %v646_v36 = vld [vmem:[%s1016_s6 + $0x10] sm:$0xff]  ;;  %v647_v38 = vld [vmem:[%s1016_s6 + $0x18] sm:$0xff] }
  0x54   : > { %302 = vmax.xlane.f32.xlu0 %v301_v14  ;;  %v322_v18 = vmax.f32 %v1030_v10, %v1032_v11  ;;  %v426_v34 = vrot.slane %v386_v27, 4  ;;  %v432_v35 = vrot.slane %v387_v28, 4  ;;  %v467_v40 = vrot.slane %v646_v36, 4  ;;  %s1158_s0 = smov (!%p287_p8, %s894_s0), 1 }
  0x55   : > { %346 = vmax.xlane.f32.xlu1 %v345_v17  ;;  %v368_v19 = vmax.f32 %v1036_v15, %v1038_v16  ;;  %v392_v25 = vrot.slane %v296_v24, %v391_v22  ;;  %v396_v26 = vrot.slane %v296_v24, %v395_v23  ;;  %v401_v31 = vstv %s295_s28  ;;  %s639_s10 = sshll.u32 %s1158_s0, 1  ;;  %s638_s9 = sshll.u32 %s1158_s0, 3 }
  0x56   : > { %v427_v41 = vadd.f32 %v426_v34, %v386_v27  ;;  %v433_v42 = vadd.f32 %v432_v35, %v387_v28  ;;  %v473_v44 = vrot.slane %v647_v38, 4  ;;  %v468_v46 = vadd.f32 %v646_v36, %v467_v40  ;;  %s294_s20 = scalar_lea.vmem %s1147_s5, %s639_s10  ;;  %s290_s30 = scalar_lea.vmem %s1146_s4, %s638_s9 }
  0x57   : > { %v399_v29 = vsub.f32 %v386_v27, %v392_v25  ;;  %v400_v30 = vsub.f32 %v387_v28, %v396_v26  ;;  %v441_v39 = vsub.f32 %v646_v36, %v392_v25  ;;  %v442_v43 = vsub.f32 %v647_v38, %v396_v26 }
  0x58   : > { %323 = vmax.xlane.f32.xlu0 %v322_v18  ;;  %v428_v47 = vrot.slane %v427_v41, 2  ;;  %v434_v48 = vrot.slane %v433_v42, 2  ;;  %v474_v50 = vadd.f32 %v647_v38, %v473_v44  ;;  %v469_v53 = vrot.slane %v468_v46, 2 }
  0x59   : > { %369 = vmax.xlane.f32.xlu1 %v368_v19  ;;  %v1052_v32 = vmul.f32 %v401_v31, %v399_v29  ;;  %v1054_v33 = vmul.f32 %v401_v31, %v400_v30  ;;  %v1060_v45 = vmul.f32 %v441_v39, %v401_v31  ;;  %v1062_v49 = vmul.f32 %v442_v43, %v401_v31 }
  0x5a   : > { %v429_v54 = vadd.f32 %v428_v47, %v427_v41  ;;  %v435_v55 = vadd.f32 %v434_v48, %v433_v42  ;;  %v475_v57 = vrot.slane %v474_v50, 2  ;;  %v470_v58 = vadd.f32 %v469_v53, %v468_v46 }
  0x5b   : > { %v404_v37 = vmax.f32 %v1052_v32, %v1054_v33  ;;  %v445_v56 = vmax.f32 %v1060_v45, %v1062_v49  ;;  %v1066_v12 = vsub.s32 %v489_v1, %v390_v21  ;;  %vm504_vm0 = vcmp.lt.s32.totalorder %v389_v20, 256 }
  0x5c   : > { %v430_v59 = vrot.slane %v429_v54, 1  ;;  %v436_v60 = vrot.slane %v435_v55, 1  ;;  %v476_v61 = vadd.f32 %v475_v57, %v474_v50  ;;  %v471_v62 = vrot.slane %v470_v58, 1 }
  0x5d   : > { %405 = vmax.xlane.f32.xlu0 %v404_v37  ;;  %446 = vmax.xlane.f32.xlu1 %v445_v56  ;;  %vm480_vm1 = vcmask 7168  }
  0x5e   : > { %v431_v63 = vadd.f32 %v430_v59, %v429_v54  ;;  %v437_v0 = vadd.f32 %v436_v60, %v435_v55  ;;  %v477_v2 = vrot.slane %v476_v61, 1  ;;  %v472_v5 = vadd.f32 %v471_v62, %v470_v58 }
  0x60   : > { %v478_v7 = vadd.f32 %v477_v2, %v476_v61  ;;  %v482_v8 = vadd.f32 %v472_v5, %v431_v63 }
  0x62   : > { %v483_v13 = vadd.f32 %v478_v7, %v437_v0 }
  0x64   : > { %v486_v14 = vcombine.low %v482_v8, %v483_v13 }
  0x66   : > { %v1069_v17 = vrot.slane %v486_v14, %v1066_v12 }
  0x68   : > { %v500_v18 = vrot.slane %v1069_v17, %v1066_v12 }
  0x6a   : > { %506 = vst.msk [vmem:[%s294_s20] sm:$0x3] %vm504_vm0, %v500_v18 }
  0xe1   : > { %v303_v19 = vpop.xlane.xlu0 %302 }
  0xe2   : > { %v1074_v22 = vsub.f32 %v1022_v3, %v303_v19  ;;  %v1077_v23 = vsub.f32 %v1024_v4, %v303_v19  ;;  %v347_v24 = vpop.xlane.xlu1 %346 }
  0xe3   : > { %v1080_v25 = vsub.f32 %v1026_v6, %v347_v24  ;;  %v1083_v21 = vsub.f32 %v1028_v9, %v347_v24 }
  0xe4   : > { %v306_v26 = vmul.f32 1.442695, %v1074_v22  ;;  %v308_v27 = vmul.f32 1.442695, %v1077_v23 }
  0xe5   : > { %v350_v28 = vmul.f32 1.442695, %v1080_v25  ;;  %v352_v29 = vmul.f32 1.442695, %v1083_v21  ;;  %v324_v3 = vpop.xlane.xlu0 %323 }
  0xe6   : > { %700 = vpow2.f32 %v306_v26  ;;  %v1090_v4 = vsub.f32 %v1030_v10, %v324_v3  ;;  %v1093_v30 = vsub.f32 %v1032_v11, %v324_v3  ;;  %v370_v6 = vpop.xlane.xlu1 %369 }
  0xe7   : > { %702 = vpow2.f32 %v308_v27  ;;  %v1096_v9 = vsub.f32 %v1036_v15, %v370_v6  ;;  %v1099_v31 = vsub.f32 %v1038_v16, %v370_v6 }
  0xe8   : > { %704 = vpow2.f32 %v350_v28  ;;  %v327_v34 = vmul.f32 1.442695, %v1090_v4  ;;  %v329_v35 = vmul.f32 1.442695, %v1093_v30 }
  0xe9   : > { %706 = vpow2.f32 %v352_v29  ;;  %v373_v10 = vmul.f32 1.442695, %v1096_v9  ;;  %v375_v36 = vmul.f32 1.442695, %v1099_v31 }
  0xea   : > { %708 = vpow2.f32 %v327_v34  ;;  %v406_v47 = vpop.xlane.xlu0 %405  ;;  %v447_v53 = vpop.xlane.xlu1 %446 }
  0xeb   : > { %710 = vpow2.f32 %v329_v35  ;;  %v407_v48 = vsub.f32 %v1052_v32, %v406_v47  ;;  %v408_v50 = vsub.f32 %v1054_v33, %v406_v47  ;;  %v448_v54 = vsub.f32 %v1060_v45, %v447_v53 }
  0xec   : > { %712 = vpow2.f32 %v373_v10  ;;  %v449_v55 = vsub.f32 %v1062_v49, %v447_v53 }
  0xed   : > { %714 = vpow2.f32 %v375_v36  ;;  %v409_v51 = vmul.f32 1.442695, %v407_v48  ;;  %v411_v52 = vmul.f32 1.442695, %v408_v50  ;;  %v450_v56 = vmul.f32 1.442695, %v448_v54 }
  0xee   : > { %v452_v57 = vmul.f32 1.442695, %v449_v55 }
  0xef   : > { %716 = vpow2.f32 %v409_v51 }
  0xf0   : > { %v701_v11 = vpop.eup %700  ;;  %718 = vpow2.f32 %v411_v52 }
  0xf1   : > { %v703_v15 = vpop.eup %702  ;;  %720 = vpow2.f32 %v450_v56 }
  0xf2   : > { %v705_v37 = vpop.eup %704  ;;  %v310_v38 = vadd.f32 %v703_v15, %v701_v11  ;;  %722 = vpow2.f32 %v452_v57 }
  0xf3   : > { %v707_v16 = vpop.eup %706 }
  0xf4   : > { %v709_v39 = vpop.eup %708  ;;  %311 = vadd.xlane.f32.xlu0 %v310_v38  ;;  %v354_v40 = vadd.f32 %v707_v16, %v705_v37 }
  0xf5   : > { %v711_v41 = vpop.eup %710 }
  0xf6   : > { %v713_v42 = vpop.eup %712  ;;  %v331_v43 = vadd.f32 %v711_v41, %v709_v39 }
  0xf7   : > { %v715_v44 = vpop.eup %714 }
  0xf8   : > { %332 = vadd.xlane.f32.xlu1 %v331_v43  ;;  %355 = vadd.xlane.f32.xlu0 %v354_v40  ;;  %v377_v46 = vadd.f32 %v715_v44, %v713_v42 }
  0xf9   : > { %v717_v58 = vpop.eup %716 }
  0xfa   : > { %v719_v59 = vpop.eup %718 }
  0xfb   : > { %v413_v60 = vadd.f32 %v719_v59, %v717_v58  ;;  %v721_v61 = vpop.eup %720 }
  0xfc   : > { %378 = vadd.xlane.f32.xlu1 %v377_v46  ;;  %v723_v32 = vpop.eup %722 }
  0xfd   : > { %414 = vadd.xlane.f32.xlu0 %v413_v60  ;;  %v454_v33 = vadd.f32 %v723_v32, %v721_v61 }
 0x100   : > { %455 = vadd.xlane.f32.xlu1 %v454_v33 }
 0x181   : > { %v312_v62 = vpop.xlane.xlu0 %311 }
 0x182   : > { %724 = vlog2.f32 %v312_v62 }
 0x185   : > { %v333_v63 = vpop.xlane.xlu1 %332  ;;  %v356_v0 = vpop.xlane.xlu0 %355 }
 0x186   : > { %726 = vlog2.f32 %v333_v63 }
 0x187   : > { %728 = vlog2.f32 %v356_v0 }
 0x189   : > { %v379_v45 = vpop.xlane.xlu1 %378 }
 0x18a   : > { %730 = vlog2.f32 %v379_v45 }
 0x18c   : > { %v725_v49 = vpop.eup %724 }
 0x18d   : > { %v314_v1 = vmul.f32 0.6931472, %v725_v49 }
 0x18f   : > { %v315_v13 = vsub.f32 %v1074_v22, %v314_v1  ;;  %v316_v14 = vsub.f32 %v1077_v23, %v314_v1 }
 0x190   : > { %v727_v2 = vpop.eup %726 }
 0x191   : > { %v729_v5 = vpop.eup %728  ;;  %v335_v7 = vmul.f32 0.6931472, %v727_v2 }
 0x192   : > { %v358_v8 = vmul.f32 0.6931472, %v729_v5 }
 0x193   : > { %v336_v19 = vsub.f32 %v1090_v4, %v335_v7  ;;  %v337_v24 = vsub.f32 %v1093_v30, %v335_v7 }
 0x194   : > { %v731_v26 = vpop.eup %730  ;;  %v359_v27 = vsub.f32 %v1080_v25, %v358_v8  ;;  %v360_v3 = vsub.f32 %v1083_v21, %v358_v8 }
 0x195   : > { %v338_v28 = vadd.f32 %v336_v19, %v315_v13  ;;  %v339_v29 = vadd.f32 %v337_v24, %v316_v14  ;;  %v381_v6 = vmul.f32 0.6931472, %v731_v26 }
 0x197   : > { %v361_v34 = vadd.f32 %v359_v27, %v338_v28  ;;  %v362_v35 = vadd.f32 %v360_v3, %v339_v29  ;;  %v382_v10 = vsub.f32 %v1096_v9, %v381_v6  ;;  %v383_v22 = vsub.f32 %v1099_v31, %v381_v6  ;;  %v415_v9 = vpop.xlane.xlu0 %414  ;;  %v456_v31 = vpop.xlane.xlu1 %455 }
 0x198   : > { %732 = vrcp.f32 %v415_v9 }
 0x199   : > { %v384_v23 = vadd.f32 %v382_v10, %v361_v34  ;;  %v385_v4 = vadd.f32 %v383_v22, %v362_v35  ;;  %734 = vrcp.f32 %v456_v31 }
 0x19b   : > { %v457_v36 = vsub.f32 %v384_v23, %v336_v19  ;;  %v458_v30 = vsub.f32 %v385_v4, %v337_v24  ;;  %v416_v11 = vsub.f32 %v384_v23, %v315_v13  ;;  %v417_v15 = vsub.f32 %v385_v4, %v316_v14 }
 0x19d   : > { %v459_v25 = vmul.f32 %v721_v61, %v457_v36  ;;  %v460_v37 = vmul.f32 %v723_v32, %v458_v30  ;;  %v418_v38 = vmul.f32 %v717_v58, %v416_v11  ;;  %v419_v16 = vmul.f32 %v719_v59, %v417_v15 }
 0x19f   : > { %v461_v21 = vadd.f32 %v460_v37, %v459_v25  ;;  %v420_v39 = vadd.f32 %v419_v16, %v418_v38 }
 0x1a1   : > { %462 = vadd.xlane.f32.xlu1 %v461_v21  ;;  %421 = vadd.xlane.f32.xlu0 %v420_v39 }
 0x1a2   : > { %v733_v42 = vpop.eup %732 }
 0x1a3   : > { %v735_v20 = vpop.eup %734 }
 0x22e   : > { %v463_v40 = vpop.xlane.xlu1 %462  ;;  %v422_v41 = vpop.xlane.xlu0 %421 }
 0x22f   : > { %v464_v43 = vsub.f32 0.0, %v463_v40  ;;  %v423_v44 = vsub.f32 0.0, %v422_v41 }
 0x231   : > { %v466_v46 = vmul.f32 %v735_v20, %v464_v43  ;;  %v425_v47 = vmul.f32 %v733_v42, %v423_v44 }
 0x233   : > { %v479_v12 = vadd.f32 %v466_v46, %v425_v47 }
 0x235   : > { %481 = vst.msk [vmem:[%s290_s30] sm:$0xff] %vm480_vm1, %v479_v12 }
 0x236 PF: > { %p20_p10 = scmp.ge.s32.totalorder %s897_s24, 4   ;;  %s1153_s20 = smov %s826_s21 }
 0x237   : > { %s1154_s21 = smov %s830_s22  ;;  %s1155_s22 = smov %s907_s27 }
 0x238   : > { %s1156_s23 = smov %s897_s24  ;;  %22 = sbr.rel (!%p20_p10) target bundleno = 7 (0x7), region = 105 }
 0x23f   :  { %540 = vsyncpa [#allocation4], 1 }
 0x240   :  { %542 = vsyncpa [#allocation4 + $0x1], 1 }
 0x241   :  { %543 = vsyncpa [#allocation6], 1 }
 0x242   :  { %545 = vsyncpa [#allocation6 + $0x1], 1 }

</bundles_post_ra>
